<compile_context>
chip_gen: v6e
topology: v6e:2x2x1
jax: 0.10.0
libtpu: 0.0.40
codegen_flags: <defaults>
</compile_context>

<pallas_src>
import jax
import jax.numpy as jnp
from jax import lax
from jax.experimental import pallas as pl
from jax.experimental.pallas import tpu as pltpu

TARGET_TILE_BYTES = 512 * 1024            # aim for >=512 KiB output tile per step
MAX_TQ = 1024                             # tokens per grid step (upper bound)
ONEHOT_TABLE_MAX_BYTES = 2 * 1024 * 1024  # one-hot streams the full table per step
ONEHOT_WORK_MAX_BYTES = 4 * 1024 * 1024   # cap on the (tq, V) iota/one-hot temps
NFLIGHT = 8                               # in-flight row DMAs on the HBM path
VMEM_HEADROOM = 4 * 1024 * 1024


def _round_up(x: int, m: int) -> int:
    return ((x + m - 1) // m) * m


def _vmem_capacity_bytes() -> int:
    """Generation-aware VMEM capacity (128 MiB v5e/v6e, 64 MiB/core v7x)."""
    try:
        cap = getattr(pltpu.get_tpu_info(), "vmem_capacity_bytes", None)
        if cap:
            return int(cap)
    except Exception:
        pass
    return 64 * 1024 * 1024  # conservative fallback: works on every generation


# ----------------------------------------------------------------------------
# Kernels
# ----------------------------------------------------------------------------
def _onehot_kernel(tq: int, vocab: int):
    """bf16 tables: one-hot MXU gather, exact and a single MXU pass."""

    def kernel(idx_ref, w_ref, o_ref, iota_ref):
        # idx_ref : VMEM (tq, 1) int32 ids (lane-sparse, needed for the compare)
        # w_ref   : VMEM (V, D)  resident bf16 table (single copy, untiled)
        # o_ref   : VMEM (tq, D) output tile
        # iota_ref: VMEM (tq, V) int32 persistent scratch, built once at step 0
        @pl.when(pl.program_id(0) == 0)
        def _():
            iota_ref[...] = lax.broadcasted_iota(jnp.int32, (tq, vocab), 1)

        onehot = (iota_ref[...] == idx_ref[...]).astype(w_ref.dtype)
        o_ref[...] = jnp.dot(
            onehot, w_ref[...], preferred_element_type=jnp.float32
        ).astype(o_ref.dtype)

    return kernel


def _vmem_gather_kernel(tq: int):
    """VMEM-resident table, exact row gather via dynamic ref indexing."""

    def kernel(ids_ref, w_ref, o_ref):
        # ids_ref: SMEM (N_pad,) int32 (scalar-prefetched token ids)
        # w_ref  : VMEM (V, D) resident table
        # o_ref  : VMEM (tq, D) output tile
        base = pl.program_id(0) * tq

        @pl.loop(0, tq)
        def _(r):
            idx = ids_ref[base + r]
            # Only tq*D elements of VMEM traffic per step (never the full table).
            o_ref[pl.ds(r, 1), :] = w_ref[pl.ds(idx, 1), :]

    return kernel


def _hbm_gather_kernel(tq: int):
    """HBM-resident table: per-row DMA gather with NFLIGHT copies in flight."""

    def kernel(ids_ref, w_hbm, o_ref, stage_ref, sems):
        # ids_ref  : SMEM (N_pad,) int32 (scalar-prefetched token ids)
        # w_hbm    : HBM (V, D) embedding table (memory_space=pl.ANY)
        # o_ref    : VMEM (tq, D) output tile
        # stage_ref: VMEM (tq, D) DMA staging buffer (scratch)
        # sems     : DMA semaphores, one per in-flight slot
        base = pl.program_id(0) * tq

        def issue(row):
            idx = ids_ref[base + row]
            pltpu.make_async_copy(
                w_hbm.at[pl.ds(idx, 1), :],
                stage_ref.at[pl.ds(row, 1), :],
                sems.at[row & (NFLIGHT - 1)],
            ).start()

        # Prime the DMA window (static, tq >= NFLIGHT by construction).
        for r in range(min(NFLIGHT, tq)):
            issue(r)

        @pl.loop(0, tq)
        def _(r):
            # Wait for row r (same byte count / dst as the copy issued for it).
            pltpu.make_async_copy(
                w_hbm.at[pl.ds(0, 1), :],
                stage_ref.at[pl.ds(r, 1), :],
                sems.at[r & (NFLIGHT - 1)],
            ).wait()

            @pl.when(r + NFLIGHT < tq)
            def _():
                issue(r + NFLIGHT)

        o_ref[...] = stage_ref[...]

    return kernel


# ----------------------------------------------------------------------------
# Wrapper
# ----------------------------------------------------------------------------
def embedding_lookup(indices, weight, *, force_path: str | None = None):
    """Pallas equivalent of Embedding.forward: returns weight[indices]."""
    idx_shape = indices.shape
    V, D = weight.shape
    itemsize = weight.dtype.itemsize

    N = 1
    for s in idx_shape:
        N *= int(s)
    if N == 0:
        return jnp.zeros((*idx_shape, D), weight.dtype)

    # Token-tile size: scale with D so each output tile is ~TARGET_TILE_BYTES
    # (lane/sublane-dense stores, amortised grid-step overhead).
    tq = TARGET_TILE_BYTES // max(D * itemsize, 1)
    tq = int(min(MAX_TQ, max(8, _round_up(tq, 8))))
    tq = min(tq, _round_up(N, 8))  # don't over-tile tiny inputs

    table_bytes = V * D * itemsize
    capacity = _vmem_capacity_bytes()
    out_tile_bytes = tq * D * itemsize

    # ---- path selection (dtype- and size-aware) ----
    if force_path is not None:
        path = force_path
    elif (
        weight.dtype == jnp.bfloat16
        and table_bytes <= ONEHOT_TABLE_MAX_BYTES
        and V <= max(8 * tq, 1024)
    ):
        # One-hot is exact + single MXU pass only for bf16; the byte gate keeps
        # the per-step table streaming below the store roofline (and is
        # deliberately conservative for v5e's slower MXU).
        path = "onehot"
    elif table_bytes + 2 * out_tile_bytes + VMEM_HEADROOM <= capacity:
        path = "vmem_gather"
    else:
        path = "hbm_gather"

    if path == "onehot":
        # Keep the (tq, V) iota scratch / one-hot temporary to a few MiB.
        cap = max(8, (ONEHOT_WORK_MAX_BYTES // (V * 4)) // 8 * 8)
        tq = min(tq, cap)
        out_tile_bytes = tq * D * itemsize

    G = (N + tq - 1) // tq
    N_pad = G * tq

    # PyTorch raises on out-of-range ids; inside a kernel we cannot, so clamp to
    # [0, V) for defined behaviour.  Pad the token stream to whole tiles (id 0).
    flat = jnp.clip(indices.reshape(-1).astype(jnp.int32), 0, V - 1)
    if N_pad != N:
        flat = jnp.pad(flat, (0, N_pad - N))
    # TODO(synk): for very large N, tile the ids through SMEM with a BlockSpec
    #             instead of scalar-prefetching the whole (N_pad,) array.

    # ---- megacore: replicating a resident table per core is only worth it
    #      when output traffic dominates table traffic ----
    out_bytes = N_pad * D * itemsize
    if path == "hbm_gather":
        parallel = G >= 2
    else:
        parallel = G >= 4 and table_bytes <= out_bytes
    dim_sem = ("parallel",) if parallel else ("arbitrary",)

    # ---- VMEM limit (generation-aware; resident table single-buffered,
    #      output/ids double-buffered by the pipeline) ----
    if path == "onehot":
        need = (table_bytes + 2 * out_tile_bytes + 2 * tq * 4
                + tq * V * 4 + 2 * tq * V * itemsize)
    elif path == "vmem_gather":
        need = table_bytes + 2 * out_tile_bytes
    else:
        need = 3 * out_tile_bytes
    vmem_limit = int(min(capacity, max(need + VMEM_HEADROOM, 32 * 1024 * 1024)))
    cparams = pltpu.CompilerParams(
        dimension_semantics=dim_sem, vmem_limit_bytes=vmem_limit
    )

    out_shape = jax.ShapeDtypeStruct((N_pad, D), weight.dtype)

    if path == "onehot":
        out = pl.pallas_call(
            _onehot_kernel(tq, V),
            out_shape=out_shape,
            grid=(G,),
            in_specs=[
                pl.BlockSpec((tq, 1), lambda i: (i, 0)),              # ids per tile
                pl.BlockSpec(memory_space=pltpu.MemorySpace.VMEM),    # resident table
            ],
            out_specs=pl.BlockSpec((tq, D), lambda i: (i, 0)),
            scratch_shapes=[pltpu.VMEM((tq, V), jnp.int32)],          # cached iota
            compiler_params=cparams,
        )(flat.reshape(N_pad, 1), weight)

    elif path == "vmem_gather":
        out = pl.pallas_call(
            _vmem_gather_kernel(tq),
            out_shape=out_shape,
            grid_spec=pltpu.PrefetchScalarGridSpec(
                num_scalar_prefetch=1,                                # ids -> SMEM
                grid=(G,),
                in_specs=[pl.BlockSpec(memory_space=pltpu.MemorySpace.VMEM)],
                out_specs=pl.BlockSpec((tq, D), lambda i, ids: (i, 0)),
            ),
            compiler_params=cparams,
        )(flat, weight)

    else:  # hbm_gather
        out = pl.pallas_call(
            _hbm_gather_kernel(tq),
            out_shape=out_shape,
            grid_spec=pltpu.PrefetchScalarGridSpec(
                num_scalar_prefetch=1,                                # ids -> SMEM
                grid=(G,),
                in_specs=[pl.BlockSpec(memory_space=pl.ANY)],         # table in HBM
                out_specs=pl.BlockSpec((tq, D), lambda i, ids: (i, 0)),
                scratch_shapes=[
                    pltpu.VMEM((tq, D), weight.dtype),                # DMA staging
                    pltpu.SemaphoreType.DMA((NFLIGHT,)),
                ],
            ),
            compiler_params=cparams,
        )(flat, weight)

    if N_pad != N:
        # TODO(synk): masked tail stores would avoid this extra output copy.
        out = out[:N]
    return out.reshape(*idx_shape, D)


# ----------------------------------------------------------------------------
if __name__ == "__main__":
    key = jax.random.PRNGKey(0)
    k_w, k_idx, k_w2 = jax.random.split(key, 3)

    num_embeddings = 32
    embedding_dim = 128
    B, S = 2, 8

    # torch.randn-style float32 weight; LongTensor-analogue int32 ids.
    weight = jax.random.normal(k_w, (num_embeddings, embedding_dim), dtype=jnp.float32)
    x = jax.random.randint(k_idx, (B, S), 0, num_embeddings, dtype=jnp.int32)
    ref = weight[x]

    # 1) f32 table -> VMEM-resident row-gather path (exact).
    out = jax.block_until_ready(embedding_lookup(x, weight))
    assert out.shape == (B, S, embedding_dim)
    assert out.dtype == jnp.float32
    assert jnp.array_equal(out, ref), "vmem_gather path mismatch"

    # 2) bf16 table -> one-hot MXU path (single pass, exact for bf16).
    weight_bf16 = jax.random.normal(k_w2, (64, embedding_dim), jnp.float32).astype(
        jnp.bfloat16
    )
    x2 = jax.random.randint(k_idx, (B, S), 0, 64, dtype=jnp.int32)
    out2 = jax.block_until_ready(embedding_lookup(x2, weight_bf16))
    assert jnp.array_equal(out2, weight_bf16[x2]), "onehot path mismatch"

    # 3) HBM-resident table path (what large vocabularies use), forced here.
    out3 = jax.block_until_ready(embedding_lookup(x, weight, force_path="hbm_gather"))
    assert jnp.array_equal(out3, ref), "hbm_gather path mismatch"

    print("KERNEL_OK")
</pallas_src>

<mosaic_0001>
module attributes {stable_mosaic.version = 11 : i64} {
  func.func @kernel(%arg0: i32, %arg1: memref<16xi32, #tpu.memory_space<smem>>, %arg2: memref<32x128xf32, #tpu.memory_space<vmem>>, %arg3: memref<16x128xf32, #tpu.memory_space<vmem>>) attributes {dimension_semantics = [#tpu.dimension_semantics<arbitrary>], iteration_bounds = array<i64: 1>, scalar_prefetch = 1 : i64, scratch_operands = 0 : i64, tpu.core_type = #tpu.core_type<tc>, window_params = [{pipeline_mode = #tpu.pipeline_mode<synchronous>, transform_indices = @transform_0, window_bounds = array<i64: 32, 128>}, {transform_indices = @transform_1, window_bounds = array<i64: 16, 128>}]} {
    %c16_i32 = arith.constant 16 : i32
    %0 = arith.muli %arg0, %c16_i32 : i32
    %c0_i32 = arith.constant 0 : i32
    %c16_i32_0 = arith.constant 16 : i32
    %1 = arith.addi %c0_i32, %c16_i32_0 : i32
    %c1_i32 = arith.constant 1 : i32
    scf.for %arg4 = %c0_i32 to %1 step %c1_i32  : i32 {
      %c1_i32_2 = arith.constant 1 : i32
      %2 = arith.muli %arg4, %c1_i32_2 : i32
      %c0_i32_3 = arith.constant 0 : i32
      %3 = arith.addi %c0_i32_3, %2 : i32
      %4 = arith.addi %0, %3 : i32
      %5 = arith.index_cast %4 : i32 to index
      %6 = memref.load %arg1[%5] : memref<16xi32, #tpu.memory_space<smem>>
      %7 = arith.index_cast %6 : i32 to index
      %c0 = arith.constant 0 : index
      %8 = vector.load %arg2[%7, %c0] : memref<32x128xf32, #tpu.memory_space<vmem>>, vector<1x128xf32>
      %9 = arith.index_cast %3 : i32 to index
      %c0_4 = arith.constant 0 : index
      %10 = vector.load %arg3[%9, %c0_4] : memref<16x128xf32, #tpu.memory_space<vmem>>, vector<1x128xf32>
      tpu.vector_store %arg3[%9, %c0_4], %8 {strides = array<i32>} : memref<16x128xf32, #tpu.memory_space<vmem>>, vector<1x128xf32>,
    }
    %c16_i32_1 = arith.constant 16 : i32
    return
  }
  func.func @transform_0(%arg0: i32, %arg1: memref<16xi32, #tpu.memory_space<smem>>) -> (i32, i32) {
    %c0_i32 = arith.constant 0 : i32
    %c0_i32_0 = arith.constant 0 : i32
    %c0_i32_1 = arith.constant 0 : i32
    return %c0_i32, %c0_i32_0 : i32, i32
  }
  func.func @transform_1(%arg0: i32, %arg1: memref<16xi32, #tpu.memory_space<smem>>) -> (i32, i32) {
    %c0_i32 = arith.constant 0 : i32
    %c0_i32_0 = arith.constant 0 : i32
    return %arg0, %c0_i32 : i32, i32
  }
}

</mosaic_0001>

<bundles_post_ra>
// kernel: tpu_custom_call.1
= control target key start
LH: loop header
LB: loop body
LE: loop exit
PB: predicated region body
PF: predicated region fallthrough
CT: control target
= control target key end

     0   :  { %s140_s9 = smov [#allocation3]   ;;  %s175_s0 = inlined_call_operand.hbm [shape: s32[16], index: 0, kind: input, shape index: {}]   ;;  %s176_s1 = inlined_call_operand.hbm [shape: f32[32,128], index: 1, kind: input, shape index: {}]   ;;  %s177_s2 = inlined_call_operand.hbm [shape: f32[16,128], index: 2, kind: output, shape index: {}]  }
   0x1   :  { %8 = dma.hbm_to_smem %s175_s0, 16, %s140_s9, [#allocation2] }
   0x2   :  { %130 = dma.done.wait [#allocation2], 16 }
   0x3   :  { %131 = vsyncadd [#allocation2], 4294967280 }
   0x4   :  { %10 = sfence }
   0x5   :  { %11 = vsyncpa [#allocation5], 0 }
   0x6   :  { %12 = vsyncpa [#allocation6], 0  ;;  %s141_s12 = smov [#allocation4]  }
   0x7   :  { %s18_s13 = sshll.u32 %s141_s12, 4  ;;  %s19_s13 = int_to_ptr.vmem [resolvable:$true] %s18_s13 }
   0x8   :  { %s94_s14 = scalar_lea.vmem %s19_s13, 512  ;;  %p99_p1 = scmp.lt.s32.totalorder %s19_s13, %s19_s13 }
   0x9   :  { %p95_p0 = scmp.ne.s32.totalorder %s19_s13, %s94_s14  ;;  %p100_p2 = scmp.lt.s32.totalorder %s94_s14, %s94_s14 }
   0xb   :  { %p101_p3 = por %p100_p2, %p99_p1 }
   0xd   :  { %p102_p4 = pnand %p101_p3, %p95_p0 }
   0xf   :  { %105 = shalt.err (!%p102_p4)
}
  0x10   :  { %s142_s15 = smov 128   ;;  %s143_s16 = smov 8  }
  0x11   :  { %24 = dma.hbm_to_vmem [thread:$0]  %s176_s1, 512, %s19_s13, [#allocation5], %s142_s15, %s142_s15, %s143_s16  }
  0x12   :  { %132 = dma.done.wait [#allocation5], 512  }
  0x13   :  { %133 = vsyncadd [#allocation5], 4294966784  ;;  %s136_s18 = smov 0  }
  0x14 LB: > { %s36_s19 = sld [smem:[#allocation3 + %s138_s18]]  ;;  %s39_s21 = scalar_lea.vmem [#allocation7], %s138_s18  ;;  %s138_s18 = sphi %s136_s18, %s34_s18  }
  0x15   : > { %s34_s18 = sadd.s32 1, %s138_s18  }
  0x16   : > { %p31_p5 = scmp.ge.s32.totalorder %s34_s18, 16  }
  0x17   :  { %s144_s22 = smov (%p31_p5), [#allocation7]  }
  0x18   :  { %33 = sbr.rel (!%p31_p5) target bundleno = 20 (0x14), region = 37  ;;  %s46_s23 = sshll.u32 (%p31_p5), %s144_s22, 4  ;;  %s47_s23 = int_to_ptr.vmem [resolvable:$true] %s46_s23 }
  0x19   :  { %s106_s24 = scalar_lea.vmem (%p31_p5), %s47_s23, 256  ;;  %p111_p7 = scmp.lt.s32.totalorder (%p31_p5), %s47_s23, %s47_s23 }
  0x1a   : > { %s37_s20 = scalar_lea.vmem [#allocation4], %s36_s19  ;;  %p107_p6 = scmp.ne.s32.totalorder (%p31_p5), %s47_s23, %s106_s24 }
  0x1b   : > { %v38_v0 = vld [vmem:[%s37_s20] sm:$0x1]  ;;  %p112_p8 = scmp.lt.s32.totalorder (%p31_p5), %s106_s24, %s106_s24 }
  0x1c   : > { %40 = vst [vmem:[%s39_s21] sm:$0x1] %v38_v0 }
  0x1d   :  { %p113_p9 = por %p112_p8, %p111_p7 }
  0x1f   :  { %p114_p10 = pnand %p113_p9, %p107_p6 }
  0x21   :  { %117 = shalt.err (!%p114_p10)
}
  0x22   :  { %52 = dma.vmem_to_hbm [thread:$0]  %s47_s23, 256, %s177_s2, [#allocation6], %s142_s15, %s142_s15, %s143_s16  }
  0x23   :  { %134 = dma.done.wait [#allocation6], 256  }
  0x24   :  { %135 = vsyncadd [#allocation6], 4294967040 }
  0x25   :  { %56 = vsyncpa [#allocation5], 1 }
  0x26   :  { %57 = vsyncpa [#allocation6], 1 }

</bundles_post_ra>
